<compile_context>
chip_gen: v7x
topology: tpu7x:2x2x1
jax: 0.10.0
libtpu: 0.0.40
codegen_flags: <defaults>
</compile_context>

<pallas_src>
import functools

import jax
import jax.numpy as jnp
from jax.experimental import pallas as pl
from jax.experimental.pallas import tpu as pltpu


def _round_up(v, m):
    return ((v + m - 1) // m) * m


def _cheb_kernel(cheb_k, supt_ref, chebt_ref):
    """Chebyshev stack in transposed form, identity term excluded.

    supt_ref : (S, Np, Np)               A^T per support
    chebt_ref: (S*(cheb_k-1), Np, Np)    U_k = T_k^T for k = 1..cheb_k-1
    Transposed recursion: U_1 = A^T, U_k = 2 * U_{k-1} @ A^T - U_{k-2}, U_0 = I.
    """
    num_sup, n, _ = supt_ref.shape
    km1 = cheb_k - 1
    prev = None
    if cheb_k >= 3:
        row = jax.lax.broadcasted_iota(jnp.int32, (n, n), 0)
        col = jax.lax.broadcasted_iota(jnp.int32, (n, n), 1)
        prev = [(row == col).astype(jnp.float32)] * num_sup        # U_0 = I
    curr = []
    for s in range(num_sup):
        a_t = supt_ref[s]
        chebt_ref[s * km1] = a_t                                   # U_1 = A^T
        curr.append(a_t)
    # k outer / s inner: the S independent recursions interleave so one support's
    # serial T_k dependency is hidden by the other's matmul.
    for k in range(2, cheb_k):
        nxt = []
        for s in range(num_sup):
            u = 2.0 * jnp.dot(curr[s], supt_ref[s],
                              preferred_element_type=jnp.float32) - prev[s]
            chebt_ref[s * km1 + (k - 1)] = u
            nxt.append(u)
        prev, curr = curr, nxt
    # TODO(synk): for graphs where (S + S*(cheb_k-1)) * Np^2 floats approaches the
    # scoped VMEM limit, this one-shot kernel would need row tiling with the
    # previous term staged through HBM.


def _agcn_kernel(x_ref, cheb_ref, w_ref, b_ref, out_ref, prop_ref, pcat_ref):
    """Fused propagate + project for one batch tile (transposed layout).

    x_ref   : (1, TB*Cp, Np)   batch tile, features x nodes, rows ordered (t, c)
    cheb_ref: (K2, Np, Np)     T_k^T stack (identity excluded), grid-resident
    w_ref   : (Op, KC)         fused transposed weights, KC = (1+K2)*Cp, resident
    b_ref   : (Op, 1)          bias column, resident
    out_ref : (TB, Op, Np)     output tile (dim_out x nodes per batch element)
    prop_ref: (1+K2, TB*Cp, Np) f32 scratch; slot 0 holds the identity term (= x)
    pcat_ref: (KC, Np)         f32 scratch; per-element concat of all terms
    """
    k2 = cheb_ref.shape[0]
    tb = out_ref.shape[0]
    cp = x_ref.shape[1] // tb

    # Propagation: one (TB*Cp, Np) @ (Np, Np) dot per Chebyshev term for the whole
    # tile -> lanes = node axis, contraction = node axis, rows = TB*Cp.
    x_all = x_ref[0].astype(jnp.float32)
    prop_ref[0] = x_all                                  # identity-term rows
    for j in range(k2):                                  # static, K2 = S*(cheb_k-1)
        prop_ref[j + 1] = jnp.dot(x_all, cheb_ref[j],
                                  preferred_element_type=jnp.float32)

    w_t = w_ref[...]                                     # hoisted out of the loop
    bias = b_ref[...]                                    # (Op, 1) broadcasts on lanes

    def body(t, carry):
        start = pl.ds(pl.multiple_of(t * cp, 8), cp)
        # Regroup this element's rows of every term into one (KC, Np) block so the
        # projection is a single dot with the full K*C contraction depth.
        for j in range(k2 + 1):                          # static, small
            pcat_ref[j * cp:(j + 1) * cp, :] = prop_ref[j, start, :]
        out_ref[t] = (jnp.dot(w_t, pcat_ref[...],
                              preferred_element_type=jnp.float32)
                      + bias).astype(out_ref.dtype)
        return carry

    jax.lax.fori_loop(0, tb, body, 0, unroll=2 if tb % 2 == 0 else 1)


def _pick_batch_tile(b, max_tb=8, min_steps=8):
    """Largest batch tile <= max_tb that still leaves >= min_steps grid steps."""
    best = 1
    for t in range(1, min(b, max_tb) + 1):
        if b % t == 0 and (b // t) >= min_steps:
            best = t
    return best


def agcn_forward(x, supports, weights, bias, cheb_k):
    """AGCN forward.

    x:        (B, N, dim_in)
    supports: (S, N, N) array or sequence of (N, N) adjacencies
    weights:  (S * cheb_k * dim_in, dim_out)
    bias:     (dim_out,)
    """
    if not isinstance(supports, jnp.ndarray):
        supports = jnp.stack(list(supports), axis=0)
    assert cheb_k >= 2, "reference always emits [I, A]; cheb_k must be >= 2"
    B, N, C = x.shape
    S = supports.shape[0]
    O = weights.shape[-1]
    assert weights.shape == (S * cheb_k * C, O)

    f32 = jnp.float32
    Np = _round_up(N, 8)             # node axis = lane axis of every dot / store
    Cp = _round_up(C, 8)
    Op = _round_up(O, 8)
    K2 = S * (cheb_k - 1)            # Chebyshev terms kept in the stack (k >= 1)
    KC = (1 + K2) * Cp               # fused projection contraction depth

    # supports -> padded A^T  (zero padding is exact: padded rows/cols never reach
    # the valid output region, and the identity term is handled analytically).
    sup_t = jnp.transpose(supports.astype(f32), (0, 2, 1))
    sup_t = jnp.pad(sup_t, ((0, 0), (0, Np - N), (0, Np - N)))

    # x -> (B, Cp, Np) "features x nodes"
    x_t = jnp.pad(jnp.transpose(x, (0, 2, 1)), ((0, 0), (0, Cp - C), (0, Np - N)))

    # Weights (S*cheb_k*C, O) -> blocks (s, k, C, O). The S identity blocks are
    # summed into one (the identity-propagated value is x for every support); the
    # rest keep (s, k) order matching the Chebyshev stack. Result: (Op, KC).
    w_blocks = weights.reshape(S, cheb_k, C, O).astype(f32)
    w_id = jnp.sum(w_blocks[:, 0], axis=0)                                # (C, O)
    w_eff = jnp.concatenate([w_id[None], w_blocks[:, 1:].reshape(K2, C, O)], axis=0)
    w_eff = jnp.pad(w_eff, ((0, 0), (0, Cp - C), (0, Op - O)))
    w_t = jnp.transpose(w_eff, (2, 0, 1)).reshape(Op, KC)
    b_t = jnp.pad(bias.astype(f32), (0, Op - O)).reshape(Op, 1)

    # --- kernel 1: Chebyshev stack (transposed), computed exactly once ----------
    if cheb_k == 2:
        cheb_t = sup_t                               # stack is just A^T per support
    else:
        need1 = 4 * Np * Np * (2 * S + 2 * K2 + 4)
        vmem1 = int(min(max(2 * need1, 32 * 2**20), 64 * 2**20))
        cheb_t = pl.pallas_call(
            functools.partial(_cheb_kernel, cheb_k),
            out_shape=jax.ShapeDtypeStruct((K2, Np, Np), f32),
            grid=(1,),
            in_specs=[pl.BlockSpec((S, Np, Np), lambda i: (0, 0, 0))],
            out_specs=pl.BlockSpec((K2, Np, Np), lambda i: (0, 0, 0)),
            compiler_params=pltpu.CompilerParams(
                dimension_semantics=("arbitrary",), vmem_limit_bytes=vmem1),
        )(sup_t)

    # --- kernel 2: fused propagation + projection over batch tiles --------------
    TB = _pick_batch_tile(B)
    G = B // TB
    x_g = x_t.reshape(G, TB * Cp, Np)                # tile rows ordered (t, c)

    flops = 2 * B * (K2 * Cp * Np * Np + Op * KC * Np)
    bytes_accessed = 4 * (B * Cp * Np + B * Op * Np + K2 * Np * Np + Op * KC + Op)
    cost = pl.CostEstimate(flops=flops, transcendentals=0,
                           bytes_accessed=bytes_accessed)

    resident = 4 * (K2 * Np * Np + Op * KC + Op)
    per_step = 4 * ((2 + 1 + K2) * TB * Cp * Np + 2 * TB * Op * Np + KC * Np)
    vmem2 = int(min(max(2 * (resident + per_step), 32 * 2**20), 64 * 2**20))

    def call(single_buffer_residents):
        def res(shape, index_map):
            if single_buffer_residents:
                # Grid-invariant inputs: single buffer, DMA'd once, stay resident.
                return pl.BlockSpec(shape, index_map, pipeline_mode=pl.Buffered(1))
            return pl.BlockSpec(shape, index_map)

        return pl.pallas_call(
            _agcn_kernel,
            out_shape=jax.ShapeDtypeStruct((B, Op, Np), x.dtype),
            grid=(G,),
            in_specs=[
                pl.BlockSpec((1, TB * Cp, Np), lambda i: (i, 0, 0)),
                res((K2, Np, Np), lambda i: (0, 0, 0)),     # resident across grid
                res((Op, KC), lambda i: (0, 0)),            # resident across grid
                res((Op, 1), lambda i: (0, 0)),             # resident across grid
            ],
            out_specs=pl.BlockSpec((TB, Op, Np), lambda i: (i, 0, 0)),
            scratch_shapes=[
                pltpu.VMEM((1 + K2, TB * Cp, Np), f32),     # propagated terms
                pltpu.VMEM((KC, Np), f32),                  # per-element concat
            ],
            compiler_params=pltpu.CompilerParams(
                dimension_semantics=("parallel",), vmem_limit_bytes=vmem2),
            cost_estimate=cost,
        )(x_g, cheb_t, w_t, b_t)

    try:
        out_t = call(True)
    except Exception:
        # Fallback for builds without BlockSpec(pipeline_mode=pl.Buffered(1)).
        out_t = call(False)

    # back to (B, N, O): XLA-side layout plumbing, removes padding.
    return jnp.transpose(out_t, (0, 2, 1))[:, :N, :O]


if __name__ == "__main__":
    key = jax.random.PRNGKey(0)
    B, N, C, O, cheb_k, S = 2, 16, 8, 32, 3, 2
    ks = jax.random.split(key, 4)
    x = jax.random.normal(ks[0], (B, N, C), jnp.float32)
    # row-stochastic adjacencies, similar to MegaCRN's softmax(relu(E E^T))
    supports = jax.nn.softmax(
        jax.random.normal(ks[1], (S, N, N), jnp.float32), axis=-1)
    weights = jax.random.normal(ks[2], (S * cheb_k * C, O), jnp.float32) * 0.1
    bias = jax.random.normal(ks[3], (O,), jnp.float32) * 0.1

    out = jax.block_until_ready(agcn_forward(x, supports, weights, bias, cheb_k))

    # pure-JAX reference mirroring the PyTorch forward
    support_set = []
    for s in range(S):
        a = supports[s]
        ks_list = [jnp.eye(N, dtype=jnp.float32), a]
        for k in range(2, cheb_k):
            ks_list.append(2.0 * a @ ks_list[-1] - ks_list[-2])
        support_set.extend(ks_list)
    x_g = jnp.concatenate(
        [jnp.einsum('nm,bmc->bnc', sm, x) for sm in support_set], axis=-1)
    ref = jnp.einsum('bni,io->bno', x_g, weights) + bias

    assert out.shape == (B, N, O)
    err = float(jnp.max(jnp.abs(out - ref)))
    assert jnp.allclose(out, ref, atol=1e-4, rtol=1e-4), err
    print("KERNEL_OK")
</pallas_src>

<mosaic_0001>
module attributes {stable_mosaic.version = 11 : i64} {
  func.func @_cheb_kernel(%arg0: i32, %arg1: memref<2x16x16xf32, #tpu.memory_space<vmem>>, %arg2: memref<4x16x16xf32, #tpu.memory_space<vmem>>) attributes {dimension_semantics = [#tpu.dimension_semantics<arbitrary>], iteration_bounds = array<i64: 1>, scalar_prefetch = 0 : i64, scratch_operands = 0 : i64, tpu.core_type = #tpu.core_type<tc>, window_params = [{pipeline_mode = #tpu.pipeline_mode<synchronous>, transform_indices = @transform_0, window_bounds = array<i64: 2, 16, 16>}, {pipeline_mode = #tpu.pipeline_mode<synchronous>, transform_indices = @transform_1, window_bounds = array<i64: 4, 16, 16>}]} {
    %0 = tpu.iota {dimensions = array<i32: 0>} : vector<16x16xi32>
    %1 = tpu.iota {dimensions = array<i32: 1>} : vector<16x16xi32>
    %2 = arith.cmpi eq, %0, %1 : vector<16x16xi32>
    %3 = arith.extui %2 : vector<16x16xi1> to vector<16x16xi32>
    %4 = arith.sitofp %3 : vector<16x16xi32> to vector<16x16xf32>
    %c0 = arith.constant 0 : index
    %c0_0 = arith.constant 0 : index
    %c0_1 = arith.constant 0 : index
    %5 = vector.load %arg1[%c0, %c0_0, %c0_1] : memref<2x16x16xf32, #tpu.memory_space<vmem>>, vector<1x16x16xf32>
    %6 = vector.shape_cast %5 : vector<1x16x16xf32> to vector<16x16xf32>
    %c0_2 = arith.constant 0 : index
    %c0_3 = arith.constant 0 : index
    %c0_4 = arith.constant 0 : index
    %7 = vector.load %arg2[%c0_2, %c0_3, %c0_4] : memref<4x16x16xf32, #tpu.memory_space<vmem>>, vector<1x16x16xf32>
    %8 = vector.shape_cast %7 : vector<1x16x16xf32> to vector<16x16xf32>
    %9 = vector.shape_cast %6 : vector<16x16xf32> to vector<1x16x16xf32>
    tpu.vector_store %arg2[%c0_2, %c0_3, %c0_4], %9 {strides = array<i32>} : memref<4x16x16xf32, #tpu.memory_space<vmem>>, vector<1x16x16xf32>,
    %c1 = arith.constant 1 : index
    %c0_5 = arith.constant 0 : index
    %c0_6 = arith.constant 0 : index
    %10 = vector.load %arg1[%c1, %c0_5, %c0_6] : memref<2x16x16xf32, #tpu.memory_space<vmem>>, vector<1x16x16xf32>
    %11 = vector.shape_cast %10 : vector<1x16x16xf32> to vector<16x16xf32>
    %c2 = arith.constant 2 : index
    %c0_7 = arith.constant 0 : index
    %c0_8 = arith.constant 0 : index
    %12 = vector.load %arg2[%c2, %c0_7, %c0_8] : memref<4x16x16xf32, #tpu.memory_space<vmem>>, vector<1x16x16xf32>
    %13 = vector.shape_cast %12 : vector<1x16x16xf32> to vector<16x16xf32>
    %14 = vector.shape_cast %11 : vector<16x16xf32> to vector<1x16x16xf32>
    tpu.vector_store %arg2[%c2, %c0_7, %c0_8], %14 {strides = array<i32>} : memref<4x16x16xf32, #tpu.memory_space<vmem>>, vector<1x16x16xf32>,
    %c0_9 = arith.constant 0 : index
    %c0_10 = arith.constant 0 : index
    %c0_11 = arith.constant 0 : index
    %15 = vector.load %arg1[%c0_9, %c0_10, %c0_11] : memref<2x16x16xf32, #tpu.memory_space<vmem>>, vector<1x16x16xf32>
    %16 = vector.shape_cast %15 : vector<1x16x16xf32> to vector<16x16xf32>
    %cst = arith.constant dense<0.000000e+00> : vector<16x16xf32>
    %17 = tpu.matmul %6, %16, %cst {dimension_numbers = #tpu.dot_dimension_numbers<[1], [0], [0], [1], [0, 0, 1, 1], [], []>} : vector<16x16xf32>, vector<16x16xf32>, vector<16x16xf32> -> vector<16x16xf32>
    %cst_12 = arith.constant 2.000000e+00 : f32
    %18 = vector.broadcast %cst_12 : f32 to vector<16x16xf32>
    %19 = arith.mulf %18, %17 : vector<16x16xf32>
    %20 = arith.subf %19, %4 : vector<16x16xf32>
    %c1_13 = arith.constant 1 : index
    %c0_14 = arith.constant 0 : index
    %c0_15 = arith.constant 0 : index
    %21 = vector.load %arg2[%c1_13, %c0_14, %c0_15] : memref<4x16x16xf32, #tpu.memory_space<vmem>>, vector<1x16x16xf32>
    %22 = vector.shape_cast %21 : vector<1x16x16xf32> to vector<16x16xf32>
    %23 = vector.shape_cast %20 : vector<16x16xf32> to vector<1x16x16xf32>
    tpu.vector_store %arg2[%c1_13, %c0_14, %c0_15], %23 {strides = array<i32>} : memref<4x16x16xf32, #tpu.memory_space<vmem>>, vector<1x16x16xf32>,
    %c1_16 = arith.constant 1 : index
    %c0_17 = arith.constant 0 : index
    %c0_18 = arith.constant 0 : index
    %24 = vector.load %arg1[%c1_16, %c0_17, %c0_18] : memref<2x16x16xf32, #tpu.memory_space<vmem>>, vector<1x16x16xf32>
    %25 = vector.shape_cast %24 : vector<1x16x16xf32> to vector<16x16xf32>
    %cst_19 = arith.constant dense<0.000000e+00> : vector<16x16xf32>
    %26 = tpu.matmul %11, %25, %cst_19 {dimension_numbers = #tpu.dot_dimension_numbers<[1], [0], [0], [1], [0, 0, 1, 1], [], []>} : vector<16x16xf32>, vector<16x16xf32>, vector<16x16xf32> -> vector<16x16xf32>
    %cst_20 = arith.constant 2.000000e+00 : f32
    %27 = vector.broadcast %cst_20 : f32 to vector<16x16xf32>
    %28 = arith.mulf %27, %26 : vector<16x16xf32>
    %29 = arith.subf %28, %4 : vector<16x16xf32>
    %c3 = arith.constant 3 : index
    %c0_21 = arith.constant 0 : index
    %c0_22 = arith.constant 0 : index
    %30 = vector.load %arg2[%c3, %c0_21, %c0_22] : memref<4x16x16xf32, #tpu.memory_space<vmem>>, vector<1x16x16xf32>
    %31 = vector.shape_cast %30 : vector<1x16x16xf32> to vector<16x16xf32>
    %32 = vector.shape_cast %29 : vector<16x16xf32> to vector<1x16x16xf32>
    tpu.vector_store %arg2[%c3, %c0_21, %c0_22], %32 {strides = array<i32>} : memref<4x16x16xf32, #tpu.memory_space<vmem>>, vector<1x16x16xf32>,
    return
  }
  func.func @transform_0(%arg0: i32) -> (i32, i32, i32) {
    %c0_i32 = arith.constant 0 : i32
    %c0_i32_0 = arith.constant 0 : i32
    %c0_i32_1 = arith.constant 0 : i32
    %c0_i32_2 = arith.constant 0 : i32
    return %c0_i32, %c0_i32_0, %c0_i32_1 : i32, i32, i32
  }
  func.func @transform_1(%arg0: i32) -> (i32, i32, i32) {
    %c0_i32 = arith.constant 0 : i32
    %c0_i32_0 = arith.constant 0 : i32
    %c0_i32_1 = arith.constant 0 : i32
    %c0_i32_2 = arith.constant 0 : i32
    return %c0_i32, %c0_i32_0, %c0_i32_1 : i32, i32, i32
  }
}

</mosaic_0001>

<bundles_post_ra>
// kernel: tpu_custom_call.1
= control target key start
LH: loop header
LB: loop body
LE: loop exit
PB: predicated region body
PF: predicated region fallthrough
CT: control target
= control target key end

     0   :  { %6 = vsyncpa [#allocation3], 0  ;;  %s388_s0 = inlined_call_operand.hbm [shape: f32[2,16,16], index: 0, kind: input, shape index: {}]   ;;  %s389_s1 = inlined_call_operand.hbm [shape: f32[4,16,16], index: 1, kind: output, shape index: {}]  }
   0x1   :  { %7 = vsyncpa [#allocation4], 0  ;;  %s331_s6 = smov [#allocation2]   ;;  %s283_s10 = scalar_lea.hbm %s388_s0, 512 }
   0x2   :  { %s13_s7 = sshll.u32 %s331_s6, 4  ;;  %p284_p0 = scmp.ne.s32.totalorder %s388_s0, %s283_s10  ;;  %s14_s7 = int_to_ptr.vmem [resolvable:$true] %s13_s7 }
   0x3   :  { %p287_p1 = scmp.lt.u32.totalorder %s283_s10, %s388_s0 }
   0x5   :  { %p289_p2 = pnand %p287_p1, %p284_p0 }
   0x7   :  { %292 = shalt.err (!%p289_p2)
}
   0x8   :  { %s293_s15 = scalar_lea.vmem %s14_s7, 512  ;;  %p298_p4 = scmp.lt.s32.totalorder %s14_s7, %s14_s7 }
   0x9   :  { %p294_p3 = scmp.ne.s32.totalorder %s14_s7, %s293_s15  ;;  %p299_p5 = scmp.lt.s32.totalorder %s293_s15, %s293_s15 }
   0xb   :  { %p300_p6 = por %p299_p5, %p298_p4 }
   0xd   :  { %p301_p7 = pnand %p300_p6, %p294_p3 }
   0xf   :  { %304 = shalt.err (!%p301_p7)
}
  0x10   :  { %s332_s16 = smov 128   ;;  %s333_s17 = smov 8  }
  0x11   :  { %19 = dma.hbm_to_vmem [thread:$0]  %s388_s0, 512, %s14_s7, [#allocation3], %s332_s16, %s332_s16, %s333_s17  }
  0x12   :  { %327 = dma.done.wait [#allocation3], 512  }
  0x13   :  { %328 = vsyncadd [#allocation3], 4294966784  ;;  %vm36_vm0 = vcmask 130048   ;;  %v45_v0 = vld [vmem:[#allocation2] sm:$0xff]  ;;  %v46_v1 = vld [vmem:[#allocation2 + $0x8] sm:$0xff]  ;;  %v23_v6 = vlaneseq  ;;  %v334_v10 = vmov 0.0  }
  0x14   :  { %v135_v2 = vld [vmem:[#allocation2 + $0x10] sm:$0xff]  ;;  %v270_v3 = vpack.c.bf16 %v46_v1, %v45_v0  ;;  %v136_v4 = vld [vmem:[#allocation2 + $0x18] sm:$0xff]  ;;  %37 = vst.msk [vmem:[#allocation5] sm:$0xff] %vm36_vm0, %v45_v0  ;;  %260 = vmatprep.mubr.msk.f32.mxu0 %vm36_vm0, %v45_v0  ;;  %38 = vst.msk [vmem:[#allocation5 + $0x8] sm:$0xff] %vm36_vm0, %v46_v1  ;;  %s335_s0 = smov [#allocation5]  }
  0x15   :  { %43 = vst.msk [vmem:[#allocation5 + $0x20] sm:$0xff] %vm36_vm0, %v135_v2  ;;  %267 = vmatprep.mubr.msk.f32.mxu1 %vm36_vm0, %v135_v2  ;;  %v274_v5 = vpack.c.bf16 %v136_v4, %v135_v2  ;;  %44 = vst.msk [vmem:[#allocation5 + $0x28] sm:$0xff] %vm36_vm0, %v136_v4  ;;  %v24_v7 = vshrl.u32 %v23_v6, 7  ;;  %v27_v9 = vand.u32 127, %v23_v6  ;;  %s230_s20 = sshll.u32 %s335_s0, 4  ;;  %s231_s20 = int_to_ptr.vmem [resolvable:$true] %s230_s20 }
  0x16   :  { %271 = vmatprep.subr.bf16.mxu0 %v270_v3  ;;  %s305_s21 = scalar_lea.vmem %s231_s20, 1024  ;;  %p310_p9 = scmp.lt.s32.totalorder %s231_s20, %s231_s20 }
  0x17   :  { %275 = vmatprep.subr.bf16.mxu1 %v274_v5  ;;  %273 = vmatpush3.bf16.msra.mxu0 %v270_v3  ;;  %v25_v8 = vadd.s32 8, %v24_v7  ;;  %vm28_vm2 = vcmp.eq.s32.totalorder %v24_v7, %v27_v9  ;;  %p306_p8 = scmp.ne.s32.totalorder %s231_s20, %s305_s21  ;;  %p311_p10 = scmp.lt.s32.totalorder %s305_s21, %s305_s21 }
  0x18   :  { %277 = vmatpush3.bf16.msra.mxu1 %v274_v5  ;;  %v242_v15 = vsel %vm28_vm2, 1.0, %v334_v10 }
  0x19   :  { %vm29_vm1 = vcmp.eq.s32.totalorder %v25_v8, %v27_v9  ;;  %p312_p11 = por %p311_p10, %p310_p9 }
  0x1a   :  { %261 = vmatmul.mubr.msk.f32.vlgmr.msra.gmra.mrb[0].mxu0 %vm36_vm0, %v46_v1  ;;  %v243_v11 = vsel %vm29_vm1, 1.0, %v334_v10 }
  0x1b   :  { %268 = vmatmul.mubr.msk.f32.vlgmr.msra.gmra.mrb[0].mxu1 %vm36_vm0, %v136_v4  ;;  %p313_p12 = pnand %p312_p11, %p306_p8 }
  0xed   :  { %v262_v12 = vpop.f32.mrb[0].mxu0 }
  0xee   :  { %v129_v13 = vmul.f32 2.0, %v262_v12  ;;  %v269_v14 = vpop.f32.mrb[0].mxu1  ;;  %v119_v16 = vpop.f32.mrb[1].mxu0 }
  0xef   :  { %v219_v17 = vmul.f32 2.0, %v269_v14  ;;  %v128_v18 = vmul.f32 2.0, %v119_v16  ;;  %v209_v19 = vpop.f32.mrb[1].mxu1 }
  0xf0   :  { %v131_v20 = vsub.f32 %v129_v13, %v243_v11  ;;  %v218_v21 = vmul.f32 2.0, %v209_v19 }
  0xf1   :  { %v221_v22 = vsub.f32 %v219_v17, %v243_v11  ;;  %v130_v23 = vsub.f32 %v128_v18, %v242_v15 }
  0xf2   :  { %134 = vst.msk [vmem:[#allocation5 + $0x18] sm:$0xff] %vm36_vm0, %v131_v20  ;;  %v220_v24 = vsub.f32 %v218_v21, %v242_v15 }
  0xf3   :  { %224 = vst.msk [vmem:[#allocation5 + $0x38] sm:$0xff] %vm36_vm0, %v221_v22  ;;  %133 = vst.msk [vmem:[#allocation5 + $0x10] sm:$0xff] %vm36_vm0, %v130_v23 }
  0xf4   :  { %223 = vst.msk [vmem:[#allocation5 + $0x30] sm:$0xff] %vm36_vm0, %v220_v24 }
  0xf5   :  { %316 = shalt.err (!%p313_p12)
}
  0xf6   :  { %s317_s24 = scalar_lea.hbm %s389_s1, 1024 }
  0xf7   :  { %p318_p13 = scmp.ne.s32.totalorder %s389_s1, %s317_s24  ;;  %p321_p0 = scmp.lt.u32.totalorder %s317_s24, %s389_s1 }
  0xf9   :  { %p323_p1 = pnand %p321_p0, %p318_p13 }
  0xfb   :  { %326 = shalt.err (!%p323_p1)
}
  0xfc   :  { %236 = dma.vmem_to_hbm [thread:$0]  %s231_s20, 1024, %s389_s1, [#allocation4], %s332_s16, %s332_s16, %s333_s17  }
  0xfd   :  { %329 = dma.done.wait [#allocation4], 1024  }
  0xfe   :  { %330 = vsyncadd [#allocation4], 4294966272 }
  0xff   :  { %240 = vsyncpa [#allocation3], 1 }
 0x100   :  { %241 = vsyncpa [#allocation4], 1 }

</bundles_post_ra>
